<compile_context>
chip_gen: v7x
topology: tpu7x:2x2x1
jax: 0.10.0
libtpu: 0.0.40
codegen_flags: <defaults>
</compile_context>

<pallas_src>
import functools

import jax
import jax.numpy as jnp
from jax import lax
from jax.experimental import pallas as pl
from jax.experimental.pallas import tpu as pltpu

LANE = 128
SUBLANE = 8
MAX_BLOCK_ROWS = 4096   # (4096, 128) f32 tile = 2 MiB; 2 inputs x 2 bufs = 8 MiB
SUB_ROWS = 64           # rows per fused accumulation step (8 vregs per input)
NUM_SLICES = 2          # parallel grid slices (map to the 2 TensorCores on v7x)


def _round_up(x, m):
    return (x + m - 1) // m * m


def _accum_chunk(x_ref, y_ref, row_off, rows_chunk, shift_x, shift_y, accs,
                 *, masked, block_row_base, n_valid):
    """Fused update of the five shifted-moment partials for one row chunk.

    Loads (rows_chunk, 128) from each input exactly once and updates all five
    (8, 128) partial sums in registers (no VMEM temporaries).
    """
    sx, sy, sxy, sxx, syy = accs
    xv = x_ref[pl.ds(row_off, rows_chunk), :].astype(jnp.float32) - shift_x
    yv = y_ref[pl.ds(row_off, rows_chunk), :].astype(jnp.float32) - shift_y
    if masked:
        # Only emitted (and only executed) for the single global last block.
        row = lax.broadcasted_iota(jnp.int32, (rows_chunk, LANE), 0)
        col = lax.broadcasted_iota(jnp.int32, (rows_chunk, LANE), 1)
        elem = (block_row_base + row_off + row) * LANE + col
        valid = elem < n_valid
        xv = jnp.where(valid, xv, 0.0)
        yv = jnp.where(valid, yv, 0.0)
    # (rows_chunk//8, 8, 128): summing over the leading axis is pure vreg-wise
    # VPU adds (no XLU).
    xr = xv.reshape(rows_chunk // SUBLANE, SUBLANE, LANE)
    yr = yv.reshape(rows_chunk // SUBLANE, SUBLANE, LANE)
    return (sx + xr.sum(axis=0),
            sy + yr.sum(axis=0),
            sxy + (xr * yr).sum(axis=0),
            sxx + (xr * xr).sum(axis=0),
            syy + (yr * yr).sum(axis=0))


def _moments_kernel(shift_ref, x_ref, y_ref, out_ref, *,
                    block_rows, blocks_per_slice, num_blocks, n_valid,
                    last_partial):
    """One grid step: accumulate this slice's 5 shifted moments for one block.

    shift_ref : (2,) f32 in SMEM  (shift_x, shift_y)
    x_ref/y_ref : (block_rows, 128) VMEM tiles (native dtype)
    out_ref   : (5, 8, 128) f32 per-slice moment slab (accumulated across the
                "arbitrary" grid axis, written back to HBM once per slice)
    """
    p = pl.program_id(0)
    i = pl.program_id(1)
    g = p * blocks_per_slice + i          # global block index for this step

    @pl.when(i == 0)
    def _init():
        out_ref[...] = jnp.zeros_like(out_ref)

    shift_x = shift_ref[0]
    shift_y = shift_ref[1]

    n_sub = block_rows // SUB_ROWS
    rem_rows = block_rows % SUB_ROWS      # multiple of 8 by construction
    block_row_base = g * block_rows

    def accumulate(masked):
        zero = jnp.zeros((SUBLANE, LANE), jnp.float32)
        accs = (zero, zero, zero, zero, zero)
        if n_sub > 0:
            def body(c, carry):
                off = pl.multiple_of(c * SUB_ROWS, SUB_ROWS)
                return _accum_chunk(x_ref, y_ref, off, SUB_ROWS,
                                    shift_x, shift_y, carry, masked=masked,
                                    block_row_base=block_row_base,
                                    n_valid=n_valid)
            accs = lax.fori_loop(0, n_sub, body, accs)
        if rem_rows > 0:
            accs = _accum_chunk(x_ref, y_ref, n_sub * SUB_ROWS, rem_rows,
                                shift_x, shift_y, accs, masked=masked,
                                block_row_base=block_row_base,
                                n_valid=n_valid)
        for k in range(5):
            out_ref[k] += accs[k]

    if last_partial:
        @pl.when(g == num_blocks - 1)
        def _tail():
            accumulate(masked=True)

        @pl.when(g < num_blocks - 1)
        def _bulk():
            accumulate(masked=False)
    else:
        @pl.when(g < num_blocks)
        def _bulk():
            accumulate(masked=False)


def my_loss_ic(pred, label, *, max_block_rows=MAX_BLOCK_ROWS):
    """loss = -tensor_corr(pred, label), streamed through a Pallas kernel."""
    assert pred.shape == label.shape, "pred and label must have the same shape"
    x = pred.reshape(-1)   # free (contiguous) reshape; native dtype streamed
    y = label.reshape(-1)
    n = x.shape[0]

    # Shift constants: correlation is shift-invariant, so subtracting an
    # approximate mean inside the kernel keeps the one-pass raw-moment
    # accumulation well conditioned in f32 (|mean| >> std case).
    k = min(n, 1024)
    shift_x = jnp.mean(x[:k].astype(jnp.float32))
    shift_y = jnp.mean(y[:k].astype(jnp.float32))
    shifts = jnp.stack([shift_x, shift_y])          # (2,) f32 -> SMEM

    # Present the stream as (rows, 128).  Lane-aligned sizes need no copy at
    # all; ragged tails still pad the flat array (the in-kernel element mask
    # makes the pad value irrelevant).
    # TODO(synk): stream ragged tails via manual DMA (memory_space=pl.ANY) to
    # avoid this pad copy entirely when n % 128 != 0.
    lane_pad = (-n) % LANE
    if lane_pad:
        x = jnp.pad(x, (0, lane_pad))
        y = jnp.pad(y, (0, lane_pad))
    rows = (n + lane_pad) // LANE
    x2d = x.reshape(rows, LANE)
    y2d = y.reshape(rows, LANE)

    block_rows = min(_round_up(max_block_rows, SUBLANE),
                     _round_up(rows, SUBLANE))      # always a multiple of 8
    num_blocks = pl.cdiv(rows, block_rows)
    blocks_per_slice = pl.cdiv(num_blocks, NUM_SLICES)
    # Only the single global last block can see rows/lanes past the real data.
    last_partial = (n % (block_rows * LANE)) != 0
    last_block = num_blocks - 1

    def data_map(p_, i_):
        g_ = p_ * blocks_per_slice + i_
        # Clamp so over-covering grid cells (num_blocks % NUM_SLICES != 0)
        # issue an in-range DMA; their contribution is skipped in the kernel.
        return (jnp.minimum(g_, last_block), 0)

    kernel = functools.partial(
        _moments_kernel,
        block_rows=block_rows,
        blocks_per_slice=blocks_per_slice,
        num_blocks=num_blocks,
        n_valid=n,
        last_partial=last_partial,
    )

    itemsize = jnp.dtype(pred.dtype).itemsize
    moments = pl.pallas_call(
        kernel,
        out_shape=jax.ShapeDtypeStruct((NUM_SLICES, 5, SUBLANE, LANE),
                                       jnp.float32),
        grid=(NUM_SLICES, blocks_per_slice),
        in_specs=[
            pl.BlockSpec(memory_space=pltpu.MemorySpace.SMEM),
            pl.BlockSpec((block_rows, LANE), data_map),
            pl.BlockSpec((block_rows, LANE), data_map),
        ],
        out_specs=pl.BlockSpec((None, 5, SUBLANE, LANE),
                               lambda p_, i_: (p_, 0, 0, 0)),
        compiler_params=pltpu.CompilerParams(
            dimension_semantics=("parallel", "arbitrary"),
            vmem_limit_bytes=32 * 1024 * 1024,
        ),
        cost_estimate=pl.CostEstimate(
            flops=8 * n,
            transcendentals=0,
            bytes_accessed=2 * n * itemsize
            + NUM_SLICES * 5 * SUBLANE * LANE * 4),
    )(shifts, x2d, y2d)

    # Finalize in plain JAX: merge per-slice slabs, then the (shifted)
    # raw-moment correlation formula (exact, since corr is shift-invariant).
    sums = jnp.sum(moments, axis=(0, 2, 3))          # (5,)
    sx, sy, sxy, sxx, syy = (sums[j] for j in range(5))
    nf = jnp.float32(n)
    num = nf * sxy - sx * sy
    varx = jnp.maximum(nf * sxx - sx * sx, jnp.float32(1e-30))
    vary = jnp.maximum(nf * syy - sy * sy, jnp.float32(1e-30))
    corr = num * lax.rsqrt(varx) * lax.rsqrt(vary)
    return -corr


class MyLossIC:
    """Drop-in analogue of the PyTorch myLoss(mode='IC') module."""

    def __init__(self, mode='IC'):
        assert mode == 'IC'
        self.mode = mode

    def __call__(self, pred, label):
        return my_loss_ic(pred, label)


def _ref_loss(pred, label):
    xf = pred.reshape(-1).astype(jnp.float32)
    yf = label.reshape(-1).astype(jnp.float32)
    xc = xf - xf.mean()
    yc = yf - yf.mean()
    return -(jnp.sum(xc * yc) /
             (jnp.sqrt(jnp.sum(xc ** 2)) * jnp.sqrt(jnp.sum(yc ** 2))))


if __name__ == "__main__":
    key = jax.random.PRNGKey(0)
    k1, k2, k3, k4 = jax.random.split(key, 4)

    # Case 1: NCHW-shaped, lane-aligned total size (batch=2, ch=4, 16x16).
    pred = jax.random.normal(k1, (2, 4, 16, 16), dtype=jnp.float32)
    label = 0.5 * pred + 0.5 * jax.random.normal(k2, (2, 4, 16, 16),
                                                 dtype=jnp.float32)
    loss = my_loss_ic(pred, label)
    jax.block_until_ready(loss)
    ref = _ref_loss(pred, label)
    assert jnp.allclose(loss, ref, atol=1e-4), (loss, ref)

    # Case 1b: same data, tiny blocks -> exercises the multi-block grid and the
    # two-slice parallel split (both slices do real work).
    loss_mb = my_loss_ic(pred, label, max_block_rows=8)
    jax.block_until_ready(loss_mb)
    assert jnp.allclose(loss_mb, ref, atol=1e-4), (loss_mb, ref)

    # Case 2: ragged size (n % 128 != 0) with large non-zero means ->
    # exercises the element mask and the shift-based conditioning.
    pred2 = 100.0 + jax.random.normal(k3, (3, 329), dtype=jnp.float32)
    label2 = 0.3 * pred2 + 0.7 * jax.random.normal(k4, (3, 329),
                                                   dtype=jnp.float32) + 50.0
    loss2 = my_loss_ic(pred2, label2)
    jax.block_until_ready(loss2)
    ref2 = _ref_loss(pred2, label2)
    assert jnp.allclose(loss2, ref2, atol=1e-3), (loss2, ref2)

    print("KERNEL_OK")
</pallas_src>

<mosaic_0001>
module attributes {stable_mosaic.version = 11 : i64} {
  func.func @_moments_kernel(%arg0: i32, %arg1: i32, %arg2: memref<2xf32, #tpu.memory_space<smem>>, %arg3: memref<16x128xf32, #tpu.memory_space<vmem>>, %arg4: memref<16x128xf32, #tpu.memory_space<vmem>>, %arg5: memref<1x5x8x128xf32, #tpu.memory_space<vmem>>) attributes {dimension_semantics = [#tpu.dimension_semantics<parallel>, #tpu.dimension_semantics<arbitrary>], iteration_bounds = array<i64: 2, 1>, scalar_prefetch = 0 : i64, scratch_operands = 0 : i64, tpu.core_type = #tpu.core_type<tc>, window_params = [{transform_indices = @transform_0, window_bounds = array<i64: 2>}, {transform_indices = @transform_1, window_bounds = array<i64: 16, 128>}, {transform_indices = @transform_2, window_bounds = array<i64: 16, 128>}, {transform_indices = @transform_3, window_bounds = array<i64: 1, 5, 8, 128>}]} {
    %c1_i32 = arith.constant 1 : i32
    %0 = arith.muli %arg0, %c1_i32 : i32
    %1 = arith.addi %0, %arg1 : i32
    %c0_i32 = arith.constant 0 : i32
    %2 = arith.cmpi eq, %arg1, %c0_i32 : i32
    %3 = arith.extui %2 : i1 to i32
    %c0_i32_0 = arith.constant 0 : i32
    %4 = arith.cmpi ne, %3, %c0_i32_0 : i32
    scf.if %4 {
      %cst = arith.constant 0.000000e+00 : f32
      %10 = vector.broadcast %cst : f32 to vector<5x8x128xf32>
      %c0_3 = arith.constant 0 : index
      %c0_4 = arith.constant 0 : index
      %c0_5 = arith.constant 0 : index
      %c0_6 = arith.constant 0 : index
      %11 = vector.load %arg5[%c0_3, %c0_4, %c0_5, %c0_6] : memref<1x5x8x128xf32, #tpu.memory_space<vmem>>, vector<1x5x8x128xf32>
      %12 = vector.shape_cast %11 : vector<1x5x8x128xf32> to vector<5x8x128xf32>
      %13 = vector.shape_cast %10 : vector<5x8x128xf32> to vector<1x5x8x128xf32>
      tpu.vector_store %arg5[%c0_3, %c0_4, %c0_5, %c0_6], %13 {strides = array<i32>} : memref<1x5x8x128xf32, #tpu.memory_space<vmem>>, vector<1x5x8x128xf32>,
    } else {
    }
    %c0 = arith.constant 0 : index
    %5 = memref.load %arg2[%c0] : memref<2xf32, #tpu.memory_space<smem>>
    %c1 = arith.constant 1 : index
    %6 = memref.load %arg2[%c1] : memref<2xf32, #tpu.memory_space<smem>>
    %c1_i32_1 = arith.constant 1 : i32
    %7 = arith.cmpi slt, %1, %c1_i32_1 : i32
    %8 = arith.extui %7 : i1 to i32
    %c0_i32_2 = arith.constant 0 : i32
    %9 = arith.cmpi ne, %8, %c0_i32_2 : i32
    scf.if %9 {
      %cst = arith.constant 0.000000e+00 : f32
      %10 = vector.broadcast %cst : f32 to vector<8x128xf32>
      %c0_3 = arith.constant 0 : index
      %c0_4 = arith.constant 0 : index
      %11 = vector.load %arg3[%c0_3, %c0_4] : memref<16x128xf32, #tpu.memory_space<vmem>>, vector<16x128xf32>
      %12 = vector.broadcast %5 : f32 to vector<16x128xf32>
      %13 = arith.subf %11, %12 : vector<16x128xf32>
      %c0_5 = arith.constant 0 : index
      %c0_6 = arith.constant 0 : index
      %14 = vector.load %arg4[%c0_5, %c0_6] : memref<16x128xf32, #tpu.memory_space<vmem>>, vector<16x128xf32>
      %15 = vector.broadcast %6 : f32 to vector<16x128xf32>
      %16 = arith.subf %14, %15 : vector<16x128xf32>
      %17 = vector.shape_cast %13 : vector<16x128xf32> to vector<2x8x128xf32>
      %18 = vector.shape_cast %16 : vector<16x128xf32> to vector<2x8x128xf32>
      %cst_7 = arith.constant dense<0.000000e+00> : vector<8x128xf32>
      %19 = vector.multi_reduction <add>, %17, %cst_7 [0] : vector<2x8x128xf32> to vector<8x128xf32>
      %20 = arith.addf %10, %19 : vector<8x128xf32>
      %cst_8 = arith.constant dense<0.000000e+00> : vector<8x128xf32>
      %21 = vector.multi_reduction <add>, %18, %cst_8 [0] : vector<2x8x128xf32> to vector<8x128xf32>
      %22 = arith.addf %10, %21 : vector<8x128xf32>
      %23 = arith.mulf %17, %18 : vector<2x8x128xf32>
      %cst_9 = arith.constant dense<0.000000e+00> : vector<8x128xf32>
      %24 = vector.multi_reduction <add>, %23, %cst_9 [0] : vector<2x8x128xf32> to vector<8x128xf32>
      %25 = arith.addf %10, %24 : vector<8x128xf32>
      %26 = arith.mulf %17, %17 : vector<2x8x128xf32>
      %cst_10 = arith.constant dense<0.000000e+00> : vector<8x128xf32>
      %27 = vector.multi_reduction <add>, %26, %cst_10 [0] : vector<2x8x128xf32> to vector<8x128xf32>
      %28 = arith.addf %10, %27 : vector<8x128xf32>
      %29 = arith.mulf %18, %18 : vector<2x8x128xf32>
      %cst_11 = arith.constant dense<0.000000e+00> : vector<8x128xf32>
      %30 = vector.multi_reduction <add>, %29, %cst_11 [0] : vector<2x8x128xf32> to vector<8x128xf32>
      %31 = arith.addf %10, %30 : vector<8x128xf32>
      %c0_12 = arith.constant 0 : index
      %c0_13 = arith.constant 0 : index
      %c0_14 = arith.constant 0 : index
      %c0_15 = arith.constant 0 : index
      %32 = vector.load %arg5[%c0_12, %c0_13, %c0_14, %c0_15] : memref<1x5x8x128xf32, #tpu.memory_space<vmem>>, vector<1x1x8x128xf32>
      %33 = vector.shape_cast %32 : vector<1x1x8x128xf32> to vector<8x128xf32>
      %34 = arith.addf %33, %20 : vector<8x128xf32>
      %c0_16 = arith.constant 0 : index
      %c0_17 = arith.constant 0 : index
      %c0_18 = arith.constant 0 : index
      %c0_19 = arith.constant 0 : index
      %35 = vector.load %arg5[%c0_16, %c0_17, %c0_18, %c0_19] : memref<1x5x8x128xf32, #tpu.memory_space<vmem>>, vector<1x1x8x128xf32>
      %36 = vector.shape_cast %35 : vector<1x1x8x128xf32> to vector<8x128xf32>
      %37 = vector.shape_cast %34 : vector<8x128xf32> to vector<1x1x8x128xf32>
      tpu.vector_store %arg5[%c0_16, %c0_17, %c0_18, %c0_19], %37 {strides = array<i32>} : memref<1x5x8x128xf32, #tpu.memory_space<vmem>>, vector<1x1x8x128xf32>,
      %c0_20 = arith.constant 0 : index
      %c1_21 = arith.constant 1 : index
      %c0_22 = arith.constant 0 : index
      %c0_23 = arith.constant 0 : index
      %38 = vector.load %arg5[%c0_20, %c1_21, %c0_22, %c0_23] : memref<1x5x8x128xf32, #tpu.memory_space<vmem>>, vector<1x1x8x128xf32>
      %39 = vector.shape_cast %38 : vector<1x1x8x128xf32> to vector<8x128xf32>
      %40 = arith.addf %39, %22 : vector<8x128xf32>
      %c0_24 = arith.constant 0 : index
      %c1_25 = arith.constant 1 : index
      %c0_26 = arith.constant 0 : index
      %c0_27 = arith.constant 0 : index
      %41 = vector.load %arg5[%c0_24, %c1_25, %c0_26, %c0_27] : memref<1x5x8x128xf32, #tpu.memory_space<vmem>>, vector<1x1x8x128xf32>
      %42 = vector.shape_cast %41 : vector<1x1x8x128xf32> to vector<8x128xf32>
      %43 = vector.shape_cast %40 : vector<8x128xf32> to vector<1x1x8x128xf32>
      tpu.vector_store %arg5[%c0_24, %c1_25, %c0_26, %c0_27], %43 {strides = array<i32>} : memref<1x5x8x128xf32, #tpu.memory_space<vmem>>, vector<1x1x8x128xf32>,
      %c0_28 = arith.constant 0 : index
      %c2 = arith.constant 2 : index
      %c0_29 = arith.constant 0 : index
      %c0_30 = arith.constant 0 : index
      %44 = vector.load %arg5[%c0_28, %c2, %c0_29, %c0_30] : memref<1x5x8x128xf32, #tpu.memory_space<vmem>>, vector<1x1x8x128xf32>
      %45 = vector.shape_cast %44 : vector<1x1x8x128xf32> to vector<8x128xf32>
      %46 = arith.addf %45, %25 : vector<8x128xf32>
      %c0_31 = arith.constant 0 : index
      %c2_32 = arith.constant 2 : index
      %c0_33 = arith.constant 0 : index
      %c0_34 = arith.constant 0 : index
      %47 = vector.load %arg5[%c0_31, %c2_32, %c0_33, %c0_34] : memref<1x5x8x128xf32, #tpu.memory_space<vmem>>, vector<1x1x8x128xf32>
      %48 = vector.shape_cast %47 : vector<1x1x8x128xf32> to vector<8x128xf32>
      %49 = vector.shape_cast %46 : vector<8x128xf32> to vector<1x1x8x128xf32>
      tpu.vector_store %arg5[%c0_31, %c2_32, %c0_33, %c0_34], %49 {strides = array<i32>} : memref<1x5x8x128xf32, #tpu.memory_space<vmem>>, vector<1x1x8x128xf32>,
      %c0_35 = arith.constant 0 : index
      %c3 = arith.constant 3 : index
      %c0_36 = arith.constant 0 : index
      %c0_37 = arith.constant 0 : index
      %50 = vector.load %arg5[%c0_35, %c3, %c0_36, %c0_37] : memref<1x5x8x128xf32, #tpu.memory_space<vmem>>, vector<1x1x8x128xf32>
      %51 = vector.shape_cast %50 : vector<1x1x8x128xf32> to vector<8x128xf32>
      %52 = arith.addf %51, %28 : vector<8x128xf32>
      %c0_38 = arith.constant 0 : index
      %c3_39 = arith.constant 3 : index
      %c0_40 = arith.constant 0 : index
      %c0_41 = arith.constant 0 : index
      %53 = vector.load %arg5[%c0_38, %c3_39, %c0_40, %c0_41] : memref<1x5x8x128xf32, #tpu.memory_space<vmem>>, vector<1x1x8x128xf32>
      %54 = vector.shape_cast %53 : vector<1x1x8x128xf32> to vector<8x128xf32>
      %55 = vector.shape_cast %52 : vector<8x128xf32> to vector<1x1x8x128xf32>
      tpu.vector_store %arg5[%c0_38, %c3_39, %c0_40, %c0_41], %55 {strides = array<i32>} : memref<1x5x8x128xf32, #tpu.memory_space<vmem>>, vector<1x1x8x128xf32>,
      %c0_42 = arith.constant 0 : index
      %c4 = arith.constant 4 : index
      %c0_43 = arith.constant 0 : index
      %c0_44 = arith.constant 0 : index
      %56 = vector.load %arg5[%c0_42, %c4, %c0_43, %c0_44] : memref<1x5x8x128xf32, #tpu.memory_space<vmem>>, vector<1x1x8x128xf32>
      %57 = vector.shape_cast %56 : vector<1x1x8x128xf32> to vector<8x128xf32>
      %58 = arith.addf %57, %31 : vector<8x128xf32>
      %c0_45 = arith.constant 0 : index
      %c4_46 = arith.constant 4 : index
      %c0_47 = arith.constant 0 : index
      %c0_48 = arith.constant 0 : index
      %59 = vector.load %arg5[%c0_45, %c4_46, %c0_47, %c0_48] : memref<1x5x8x128xf32, #tpu.memory_space<vmem>>, vector<1x1x8x128xf32>
      %60 = vector.shape_cast %59 : vector<1x1x8x128xf32> to vector<8x128xf32>
      %61 = vector.shape_cast %58 : vector<8x128xf32> to vector<1x1x8x128xf32>
      tpu.vector_store %arg5[%c0_45, %c4_46, %c0_47, %c0_48], %61 {strides = array<i32>} : memref<1x5x8x128xf32, #tpu.memory_space<vmem>>, vector<1x1x8x128xf32>,
    } else {
    }
    return
  }
  func.func @transform_0(%arg0: i32, %arg1: i32) -> i32 {
    %c0_i32 = arith.constant 0 : i32
    %c0_i32_0 = arith.constant 0 : i32
    return %c0_i32 : i32
  }
  func.func @transform_1(%arg0: i32, %arg1: i32) -> (i32, i32) {
    %c1_i32 = arith.constant 1 : i32
    %0 = arith.muli %arg0, %c1_i32 : i32
    %1 = arith.addi %0, %arg1 : i32
    %c0_i32 = arith.constant 0 : i32
    %2 = arith.minsi %1, %c0_i32 : i32
    %c0_i32_0 = arith.constant 0 : i32
    %c0_i32_1 = arith.constant 0 : i32
    return %2, %c0_i32_0 : i32, i32
  }
  func.func @transform_2(%arg0: i32, %arg1: i32) -> (i32, i32) {
    %c1_i32 = arith.constant 1 : i32
    %0 = arith.muli %arg0, %c1_i32 : i32
    %1 = arith.addi %0, %arg1 : i32
    %c0_i32 = arith.constant 0 : i32
    %2 = arith.minsi %1, %c0_i32 : i32
    %c0_i32_0 = arith.constant 0 : i32
    %c0_i32_1 = arith.constant 0 : i32
    return %2, %c0_i32_0 : i32, i32
  }
  func.func @transform_3(%arg0: i32, %arg1: i32) -> (i32, i32, i32, i32) {
    %c0_i32 = arith.constant 0 : i32
    %c0_i32_0 = arith.constant 0 : i32
    %c0_i32_1 = arith.constant 0 : i32
    %c0_i32_2 = arith.constant 0 : i32
    return %arg0, %c0_i32, %c0_i32_0, %c0_i32_1 : i32, i32, i32, i32
  }
}

</mosaic_0001>

<bundles_post_ra>
// kernel: tpu_custom_call.1
= control target key start
LH: loop header
LB: loop body
LE: loop exit
PB: predicated region body
PF: predicated region fallthrough
CT: control target
= control target key end

     0   :  { %s1075_s0 = inlined_call_operand.hbm [shape: f32[2], index: 0, kind: input, shape index: {}]   ;;  %s1076_s1 = inlined_call_operand.hbm [shape: f32[16,128], index: 1, kind: input, shape index: {}]   ;;  %s1077_s2 = inlined_call_operand.hbm [shape: f32[16,128], index: 2, kind: input, shape index: {}]   ;;  %s1078_s3 = inlined_call_operand.hbm [shape: f32[2,5,8,128], index: 3, kind: output, shape index: {}]  }
   0x1   :  { %1085 = sst [smem:[#allocation15_spill]] %s1075_s0 }
   0x2   :  { %8 = vsyncpa [#allocation5], 0 }
   0x3   :  { %9 = vsyncpa [#allocation3], 0 }
   0x4   :  { %11 = vsyncpa [#allocation3 + $0x1], 0 }
   0x5   :  { %12 = vsyncpa [#allocation8], 0 }
   0x6   :  { %14 = vsyncpa [#allocation8 + $0x1], 0 }
   0x7   :  { %15 = vsyncpa [#allocation4], 0 }
   0x8   :  { %17 = vsyncpa [#allocation4 + $0x1], 0  ;;  %s824_s12 = smov 0   ;;  %s826_s13 = smov 0  }
   0x9   :  { %s828_s14 = smov 0   ;;  %s830_s15 = smov 0  }
   0xa   :  { %s832_s16 = smov 0   ;;  %s834_s17 = smov 0  }
   0xb   :  { %s836_s18 = smov 0   ;;  %s838_s19 = smov 0  }
   0xc LB: > { %s470_s20 = sadd.s32 4294967295, %s793_s19   ;;  %s471_s21 = sadd.s32 4294967294, %s793_s19   ;;  %s793_s19 = sphi %s838_s19, %s23_s19   ;;  %s789_s18 = sphi %s836_s18, %s1107_s18   ;;  %s785_s17 = sphi %s834_s17, %s1106_s17   ;;  %s781_s16 = sphi %s832_s16, %s1065_s16   ;;  %s777_s15 = sphi %s830_s15, %s1105_s15   ;;  %s773_s14 = sphi %s828_s14, %s1104_s14   ;;  %s769_s13 = sphi %s826_s13, %s1103_s13   ;;  %s765_s12 = sphi %s824_s12, %s1102_s12  }
   0xd   : > { %p762_p0 = scmp.ne.s32.totalorder %s781_s16, 0  ;;  %p77_p1 = scmp.eq.s32.totalorder %s793_s19, 0 }
   0xe   : > { %p82_p2 = scmp.ne.s32.totalorder %s781_s16, %s777_s15  ;;  %p867_p3 = scmp.eq.s32.totalorder %s470_s20, 0 }
   0xf   : > { %s127_s23 = sadd.s32 1, %s773_s14  ;;  %p872_p4 = por %p762_p0, %p77_p1 }
  0x10   : > { %s1086_s22 = scalar_select %p867_p3, 1, 0 }
  0x11   : > { %p137_p5 = scmp.ne.s32.totalorder %s773_s14, %s769_s13  ;;  %p880_p6 = por %p867_p3, %p82_p2 }
  0x12   : > { %p138_p7 = scmp.eq.s32.totalorder %s470_s20, 1  ;;  %p143_p8 = scmp.ne.s32.totalorder %s769_s13, %s765_s12 }
  0x13   : > { %s1088_s25 = scalar_select %p880_p6, 1, 0 }
  0x14   : > { %p144_p9 = scmp.eq.s32.totalorder %s471_s21, 1  ;;  %p886_p10 = por %p138_p7, %p137_p5 }
  0x15   : > { %p472_p11 = scmp.ge.s32.totalorder %s793_s19, 1  ;;  %p151_p13 = scmp.lt.s32.totalorder %s793_s19, 3 }
  0x16   : > { %s1089_s26 = scalar_select %p886_p10, 1, 0 }
  0x17   : > { %p891_p12 = por %p144_p9, %p143_p8  ;;  %p896_p0 = pnand %p472_p11, %p151_p13 }
  0x18   : > { %p528_p2 = scmp.lt.s32.totalorder %s793_s19, 2  ;;  %s35_s30 = sadd.s32 1, %s789_s18 }
  0x19   : > { %s1090_s27 = scalar_select %p891_p12, 1, 0 }
  0x1a   : > { %s1091_s28 = scalar_select %p896_p0, 1, 0 }
  0x1b   : > { %p512_p6 = pneg %p896_p0  ;;  %p906_p5 = pnand %p528_p2, %p872_p4 }
  0x1c   : > { %p37_p8 = scmp.ge.s32.totalorder %s35_s30, 2  ;;  %s1093_s0 = sld [smem:[#allocation15_spill]] }
  0x1d   : > { %p513_p7 = pnand %p512_p6, %p867_p3 }
  0x1f   : > { %p611_p11 = pneg %p513_p7 }
  0x22   : > { %s609_s6 = scalar_lea.hbm %s1093_s0, 16 }
  0x23   : > { %p610_p9 = scmp.ne.s32.totalorder %s1093_s0, %s609_s6  ;;  %p616_p4 = scmp.lt.u32.totalorder %s609_s6, %s1093_s0 }
  0x25   : > { %p612_p13 = pnand %p611_p11, %p610_p9 }
  0x27   : > { %p613_p1 = pneg %p612_p13 }
  0x29   : > { %p618_p2 = pnand %p616_p4, %p613_p1 }
  0x2b   : > { %621 = shalt.err (!%p618_p2)
}
  0x2c   : > { %s795_s11 = smov [#allocation2]   ;;  %s1109_s30 = smov (%p37_p8, %s35_s30), 0 }
  0x2d   : > { %515 = dma.hbm_to_smem (!%p513_p7), %s1093_s0, 16, %s795_s11, [#allocation5]  }
  0x2e   : > { %1094 = sst [smem:[#allocation14_spill]] %s1109_s30  ;;  %s124_s21 = ssub.s32 %s789_s18, %s1109_s30 }
  0x2f   : > { %p125_p6 = scmp.eq.s32.totalorder %s124_s21, 0  ;;  %s796_s4 = smov [#allocation6]  }
  0x30   : > { %s187_s5 = sshll.u32 %s796_s4, 4  ;;  %s622_s8 = scalar_lea.hbm %s1076_s1, 256  ;;  %s188_s5 = int_to_ptr.vmem [resolvable:$true] %s187_s5 }
  0x31   : > { %s932_s24 = scalar_select %p125_p6, %s773_s14, %s127_s23  }
  0x32   : > { %p623_p1 = scmp.ne.s32.totalorder %s1076_s1, %s622_s8  ;;  %p624_p7 = pneg %p906_p5 }
  0x33   : > { %p629_p11 = scmp.lt.u32.totalorder %s622_s8, %s622_s8  ;;  %p631_p13 = scmp.lt.u32.totalorder %s622_s8, %s1076_s1 }
  0x34   : > { %p625_p8 = pnand %p624_p7, %p623_p1 }
  0x35   : > { %p632_p4 = por %p631_p13, %p629_p11 }
  0x36   : > { %p626_p9 = pneg %p625_p8 }
  0x38   : > { %p633_p2 = pnand %p632_p4, %p626_p9 }
  0x3a   : > { %636 = shalt.err (!%p633_p2)
}
  0x3b   : > { %s637_s15 = scalar_lea.vmem %s188_s5, 256  ;;  %s644_s20 = scalar_lea.vmem %s188_s5, 512 }
  0x3c   : > { %p638_p6 = scmp.ne.s32.totalorder %s188_s5, %s637_s15  ;;  %p645_p3 = scmp.lt.s32.totalorder %s188_s5, %s188_s5 }
  0x3d   : > { %p646_p0 = scmp.lt.s32.totalorder %s644_s20, %s637_s15 }
  0x3e   : > { %p640_p12 = pnand %p638_p6, %p624_p7 }
  0x3f   : > { %p647_p1 = por %p646_p0, %p645_p3 }
  0x40   : > { %p641_p10 = pneg %p640_p12 }
  0x42   : > { %p648_p8 = pnand %p647_p1, %p641_p10 }
  0x44   : > { %651 = shalt.err (!%p648_p8)
}
  0x45   : > { %s797_s21 = smov 128   ;;  %s798_s4 = smov 8  }
  0x46   : > { %519 = dma.hbm_to_vmem [thread:$0]  (!%p906_p5), %s1076_s1, 256, %s188_s5, [#allocation3], %s797_s21, %s797_s21, %s798_s4  }
  0x47   : > { %s799_s8 = smov [#allocation7]   ;;  %s652_s11 = scalar_lea.hbm %s1077_s2, 256 }
  0x48   : > { %s211_s9 = sshll.u32 %s799_s8, 4  ;;  %p653_p3 = scmp.ne.s32.totalorder %s1077_s2, %s652_s11  ;;  %s212_s9 = int_to_ptr.vmem [resolvable:$true] %s211_s9 }
  0x49   : > { %p659_p0 = scmp.lt.u32.totalorder %s652_s11, %s652_s11  ;;  %p661_p9 = scmp.lt.u32.totalorder %s652_s11, %s1077_s2 }
  0x4a   : > { %p655_p10 = pnand %p653_p3, %p624_p7 }
  0x4b   : > { %p662_p11 = por %p661_p9, %p659_p0 }
  0x4c   : > { %p656_p12 = pneg %p655_p10 }
  0x4e   : > { %p663_p13 = pnand %p662_p11, %p656_p12 }
  0x50   : > { %666 = shalt.err (!%p663_p13)
}
  0x51   : > { %s667_s5 = scalar_lea.vmem %s212_s9, 256  ;;  %s674_s6 = scalar_lea.vmem %s212_s9, 512 }
  0x52   : > { %p668_p4 = scmp.ne.s32.totalorder %s212_s9, %s667_s5  ;;  %p675_p1 = scmp.lt.s32.totalorder %s212_s9, %s212_s9 }
  0x53   : > { %p676_p8 = scmp.lt.s32.totalorder %s674_s6, %s667_s5 }
  0x54   : > { %p670_p2 = pnand %p668_p4, %p624_p7 }
  0x55   : > { %p677_p3 = por %p676_p8, %p675_p1 }
  0x56   : > { %p671_p6 = pneg %p670_p2 }
  0x58   : > { %p678_p10 = pnand %p677_p3, %p671_p6 }
  0x5a   : > { %681 = shalt.err (!%p678_p10)
}
  0x5b   : > { %522 = dma.hbm_to_vmem [thread:$0]  (!%p906_p5), %s1077_s2, 256, %s212_s9, [#allocation8], %s797_s21, %s797_s21, %s798_s4  }
  0x5c   : > { %p1095_p12 = scmp.ne.s32.totalorder %s1091_s28, 0 }
  0x5d   : > { %p1096_p0 = scmp.ne.s32.totalorder (!%p1095_p12), %s1086_s22, 0 }
  0x5e   : > { %223 = sbr.rel (%p1095_p12) target bundleno = 154 (0x9a), region = 32 }
  0x65   : > { %747 = dma.done.wait (%p1096_p0), [#allocation5], 16  }
  0x66   : > { %749 = vsyncadd (%p1096_p0), [#allocation5], 4294967280  ;;  %s229_s7 = sand.u32 1, %s781_s16   ;;  %p1097_p7 = scmp.ne.s32.totalorder %s1088_s25, 0 }
  0x67   : > { %s483_s8 = sshll.u32 %s229_s7, 4  ;;  %s230_s10 = scalar_lea.sflag [#allocation3], %s229_s7 }
  0x68   : > { %s233_s23 = scalar_lea.vmem [#allocation6], %s483_s8 }
  0x69   : > { %751 = dma.done.wait (%p1097_p7), %s230_s10, 256  }
  0x6a   : > { %753 = vsyncadd (%p1097_p7), %s230_s10, 4294967040  ;;  %s239_s28 = scalar_lea.sflag [#allocation8], %s229_s7  ;;  %s242_s29 = scalar_lea.vmem [#allocation7], %s483_s8 }
  0x6b   : > { %755 = dma.done.wait (%p1097_p7), %s239_s28, 256  }
  0x6c   : > { %757 = vsyncadd (%p1097_p7), %s239_s28, 4294967040 }
  0x6d   : > { %247 = sfence }
  0x6e   : > { %s268_s22 = sand.u32 1, %s769_s13   ;;  %s289_s21 = sld [smem:[#allocation2]]  ;;  %v800_v0 = vmov 0.0  }
  0x6f   : > { %s500_s4 = smul.u32 40, %s268_s22  ;;  %s485_s9 = sld [smem:[#allocation2 + $0x1]] }
  0x70   : > { %p486_p5 = scmp.ge.s32.totalorder %s785_s17, 1 }
  0x71   : > { %s994_s11 = scalar_lea.vmem [#allocation9], %s500_s4  ;;  %v295_v1 = vld [vmem:[%s233_s23] sm:$0xff] (!%p486_p5)  ;;  %v296_v2 = vld [vmem:[%s233_s23 + $0x8] sm:$0xff] (!%p486_p5) }
  0x72   : > { %284 = vst [vmem:[%s994_s11] sm:$0xff] %v800_v0  ;;  %285 = vst [vmem:[%s994_s11 + $0x8] sm:$0xff] %v800_v0  ;;  %294 = sbr.rel (%p486_p5) target bundleno = 128 (0x80), region = 52  ;;  %v300_v6 = vld [vmem:[%s242_s29] sm:$0xff] (!%p486_p5)  ;;  %v301_v7 = vld [vmem:[%s242_s29 + $0x8] sm:$0xff] (!%p486_p5) }
  0x73   : > { %286 = vst [vmem:[%s994_s11 + $0x10] sm:$0xff] %v800_v0  ;;  %287 = vst [vmem:[%s994_s11 + $0x18] sm:$0xff] %v800_v0 }
  0x74   : > { %288 = vst [vmem:[%s994_s11 + $0x20] sm:$0xff] %v800_v0  ;;  %v297_v3 = vstv (!%p486_p5), %s289_s21 }
  0x75   : > { %v298_v4 = vsub.f32 (!%p486_p5), %v295_v1, %v297_v3  ;;  %v299_v5 = vsub.f32 (!%p486_p5), %v296_v2, %v297_v3  ;;  %v302_v8 = vstv (!%p486_p5), %s485_s9 }
  0x76   : > { %v303_v10 = vsub.f32 (!%p486_p5), %v300_v6, %v302_v8  ;;  %v304_v11 = vsub.f32 (!%p486_p5), %v301_v7, %v302_v8 }
  0x77   : > { %v305_v12 = vadd.f32 (!%p486_p5), %v299_v5, %v298_v4  ;;  %v313_v14 = vmul.f32 (!%p486_p5), %v298_v4, %v298_v4  ;;  %v314_v15 = vmul.f32 (!%p486_p5), %v299_v5, %v299_v5 }
  0x78   : > { %v307_v16 = vadd.f32 (!%p486_p5), %v304_v11, %v303_v10  ;;  %v309_v17 = vmul.f32 (!%p486_p5), %v303_v10, %v298_v4  ;;  %v310_v18 = vmul.f32 (!%p486_p5), %v304_v11, %v299_v5  ;;  %v317_v20 = vmul.f32 (!%p486_p5), %v303_v10, %v303_v10 }
  0x79   : > { %v321_v9 = vld [vmem:[%s994_s11] sm:$0xff]  ;;  %v487_v13 = vld [vmem:[%s994_s11 + $0x8] sm:$0xff]  ;;  %v315_v23 = vadd.f32 %v314_v15, %v313_v14  ;;  %v318_v24 = vmul.f32 %v304_v11, %v304_v11 }
  0x7a   : > { %v491_v19 = vld [vmem:[%s994_s11 + $0x18] sm:$0xff]  ;;  %v322_v21 = vadd.f32 %v321_v9, %v305_v12  ;;  %v489_v22 = vld [vmem:[%s994_s11 + $0x10] sm:$0xff]  ;;  %v326_v25 = vadd.f32 %v487_v13, %v307_v16  ;;  %v311_v26 = vadd.f32 %v310_v18, %v309_v17 }
  0x7b   : > { %v493_v27 = vld [vmem:[%s994_s11 + $0x20] sm:$0xff]  ;;  %v334_v28 = vadd.f32 %v491_v19, %v315_v23  ;;  %v319_v29 = vadd.f32 %v318_v24, %v317_v20 }
  0x7c   : > { %323 = vst [vmem:[%s994_s11] sm:$0xff] %v322_v21  ;;  %488 = vst [vmem:[%s994_s11 + $0x8] sm:$0xff] %v326_v25  ;;  %v330_v30 = vadd.f32 %v489_v22, %v311_v26 }
  0x7d   : > { %492 = vst [vmem:[%s994_s11 + $0x18] sm:$0xff] %v334_v28  ;;  %v338_v31 = vadd.f32 %v493_v27, %v319_v29 }
  0x7e   : > { %490 = vst [vmem:[%s994_s11 + $0x10] sm:$0xff] %v330_v30 }
  0x7f   : > { %494 = vst [vmem:[%s994_s11 + $0x20] sm:$0xff] %v338_v31 }
  0x80 PF: > { %s501_s25 = smul.u32 640, %s785_s17  ;;  %s354_s15 = sshll.u32 %s994_s11, 4  ;;  %s1019_s15 = int_to_ptr.vmem [resolvable:$true] %s354_s15 }
  0x81   : > { %s1023_s0 = scalar_lea.sflag [#allocation4], %s268_s22  ;;  %s682_s30 = scalar_lea.vmem %s1019_s15, 640 }
  0x82   : > { %s1017_s6 = scalar_lea.hbm %s1078_s3, %s501_s25  ;;  %p683_p9 = scmp.ne.s32.totalorder %s1019_s15, %s682_s30 }
  0x83   : > { %p1098_p11 = scmp.ne.s32.totalorder %s1089_s26, 0  ;;  %s801_s17 = smov [#allocation9]  }
  0x84   : > { %s686_s7 = sshll.u32 %s801_s17, 4  ;;  %s687_s7 = int_to_ptr.vmem [resolvable:$false] %s686_s7 }
  0x85   : > { %p684_p13 = pnand %p683_p9, %p1098_p11  ;;  %s688_s8 = scalar_lea.vmem %s687_s7, 1280 }
  0x86   : > { %p689_p2 = scmp.lt.s32.totalorder %s1019_s15, %s687_s7  ;;  %p690_p6 = scmp.lt.s32.totalorder %s688_s8, %s682_s30 }
  0x87   : > { %p685_p4 = pneg %p684_p13 }
  0x88   : > { %p691_p1 = por %p690_p6, %p689_p2 }
  0x8a   : > { %p692_p8 = pnand %p691_p1, %p685_p4 }
  0x8c   : > { %695 = shalt.err (!%p692_p8)
}
  0x8d   : > { %s696_s10 = scalar_lea.hbm %s1017_s6, 640  ;;  %s700_s29 = scalar_lea.hbm %s1078_s3, 1280 }
  0x8e   : > { %p697_p3 = scmp.ne.s32.totalorder %s1017_s6, %s696_s10  ;;  %p701_p0 = scmp.lt.u32.totalorder %s1017_s6, %s1078_s3 }
  0x8f   : > { %p702_p7 = scmp.lt.u32.totalorder %s700_s29, %s696_s10  ;;  %p704_p9 = scmp.lt.u32.totalorder %s696_s10, %s1017_s6 }
  0x90   : > { %p698_p10 = pnand %p697_p3, %p1098_p11 }
  0x91   : > { %p703_p5 = por %p702_p7, %p701_p0 }
  0x92   : > { %p699_p12 = pneg %p698_p10 }
  0x93   : > { %p705_p13 = por %p704_p9, %p703_p5 }
  0x95   : > { %p706_p4 = pnand %p705_p13, %p699_p12 }
  0x97   : > { %709 = shalt.err (!%p706_p4)
}
  0x98   : > { %s802_s4 = smov 128   ;;  %s803_s9 = smov 8  }
  0x99   : > { %510 = dma.vmem_to_hbm [thread:$0]  (%p1098_p11), %s1019_s15, 640, %s1017_s6, %s1023_s0, %s802_s4, %s802_s4, %s803_s9  }
  0x9a PF: > { %s369_s11 = sand.u32 1, %s765_s12   ;;  %p1099_p2 = scmp.ne.s32.totalorder %s1090_s27, 0 }
  0x9b   : > { %p1100_p6 = scmp.ge.s32.totalorder %s793_s19, 2  ;;  %s370_s25 = scalar_lea.sflag [#allocation4], %s369_s11 }
  0x9d   : > { %p524_p1 = pnand %p1100_p6, %p1099_p2 }
  0x9f   : > { %759 = dma.done.wait (!%p524_p1), %s370_s25, 640  }
  0xa0   : > { %761 = vsyncadd (!%p524_p1), %s370_s25, 4294966656  ;;  %s23_s19 = sadd.s32 1, %s793_s19   ;;  %s1101_s26 = sld [smem:[#allocation14_spill]] }
  0xa1   : > { %p20_p8 = scmp.ge.s32.totalorder %s23_s19, 4   ;;  %s1102_s12 = smov %s769_s13 }
  0xa2   : > { %s1103_s13 = smov %s773_s14  ;;  %s1104_s14 = smov %s932_s24 }
  0xa3   : > { %s1105_s15 = smov %s781_s16  ;;  %s1065_s16 = smov 0  }
  0xa4   : > { %s1106_s17 = smov %s789_s18  ;;  %22 = sbr.rel (!%p20_p8) target bundleno = 12 (0xc), region = 107 }
  0xa6   : > { %s1107_s18 = smov %s1101_s26 }
  0xab   :  { %375 = vsyncpa [#allocation3], 1 }
  0xac   :  { %377 = vsyncpa [#allocation3 + $0x1], 1 }
  0xad   :  { %378 = vsyncpa [#allocation8], 1 }
  0xae   :  { %380 = vsyncpa [#allocation8 + $0x1], 1 }
  0xaf   :  { %381 = vsyncpa [#allocation4], 1 }
  0xb0   :  { %383 = vsyncpa [#allocation4 + $0x1], 1 }
  0xb1   :  { %384 = vsyncpa [#allocation5], 1 }
  0xb2   :  { %386 = vsyncpa [#allocation5 + $0x1], 1 }

</bundles_post_ra>
